<compile_context>
chip_gen: v6e
topology: v6e:2x2x1
jax: 0.10.0
libtpu: 0.0.40
codegen_flags: <defaults>
</compile_context>

<pallas_src>
import functools
import math

import jax
import jax.numpy as jnp
from jax.experimental import pallas as pl
from jax.experimental.pallas import tpu as pltpu


def _round_up(x, m):
    return ((x + m - 1) // m) * m


def _note_encoder_kernel(tok_ref, typ_ref, dur_ref, w_ref, b_ref, out_ref,
                         *, n_vocab, n_types):
    """One grid step: produce a lane-dense [Rr, L] slab of the output.

    tok_ref/typ_ref/dur_ref : [G, Rr]     de-interleaved ids / durations
                                          (element [g, r] is flat token n = r*G+g)
    w_ref                   : [G, Vp, L]  fused, pre-scaled, lane-shifted table
                                          rows: [emb*sqrt(H); type_emb*sqrt(H);
                                                 dur_w; zero pad]
    b_ref                   : [1, L]      dur bias tiled across the G lane groups
    out_ref                 : [Rr, L]     L = G*H; element [r, g*H + h] is output
                                          feature h of flat token n = r*G + g
    """
    G, Rr = tok_ref.shape
    Vp = w_ref.shape[1]
    dur_row = n_vocab + n_types

    tok = tok_ref[...]
    typ = typ_ref[...]
    dur = dur_ref[...].astype(jnp.float32)

    # Hoisted once per grid step, reused by every lane-group band.
    row_iota = jax.lax.broadcasted_iota(jnp.int32, (Vp, Rr), 0)

    # Contract dim 0 of the activation with dim 0 of the table (lhs^T @ rhs):
    # keeps the [Vp, Rr] activation in the orientation that is cheapest to build
    # (ids live on the lane axis), so no in-kernel transpose of the id vectors.
    contract0 = (((0,), (0,)), ((), ()))

    acc = None
    for g in range(G):                      # G <= 4, static and tiny
        tok_g = tok[g:g + 1, :]             # [1, Rr]
        typ_g = typ[g:g + 1, :]
        dur_g = dur[g:g + 1, :]
        # Fused activation: token one-hot band + type one-hot band + duration row.
        # One-hot values are exactly representable, so the MXU gather is exact
        # (verified by the runtime assert in __main__).
        a = ((row_iota == tok_g).astype(jnp.float32)
             + (row_iota == (typ_g + n_vocab)).astype(jnp.float32)
             + jnp.where(row_iota == dur_row, dur_g, 0.0))           # [Vp, Rr]
        contrib = jax.lax.dot_general(a, w_ref[g], contract0,
                                      preferred_element_type=jnp.float32)
        acc = contrib if acc is None else acc + contrib              # [Rr, L]

    # Single full-block, lane-dense store.
    out_ref[...] = acc + b_ref[...]


# Conservative per-step VMEM budget: fits v7x's 32 MiB scoped limit (64 MiB
# physical) and v5e/v6e once vmem_limit_bytes is raised to 32 MiB below.
_VMEM_BUDGET = 20 * 1024 * 1024


def _choose_tiling(n_tokens, hidden, v_pad):
    """Pick (G, L, Rr, rows_total): lane-group factor, lane width, row tile,
    total (padded) slab rows."""
    if hidden < 128 and 128 % hidden == 0:
        g = 128 // hidden                   # tokens packed per 128-lane row
    else:
        g = 1                               # H >= 128 (or odd H): plain [Rr, H] blocks
    lane = g * hidden
    rows_needed = pl.cdiv(n_tokens, g)

    def vmem_bytes(rr):
        out_b = 2 * rr * lane * 4                   # double-buffered output block
        ids_b = 3 * 2 * g * rr * 4                  # tok/typ/dur blocks
        tbl_b = 2 * (g * v_pad * lane + lane) * 4   # fused table + bias (both buffers)
        tmp_b = 4 * v_pad * rr * 4                  # one-hot / activation transients
        return out_b + ids_b + tbl_b + tmp_b

    rr = 4096                                       # ~2 MiB output block at lane=128
    while rr > 128 and vmem_bytes(rr) > _VMEM_BUDGET:
        rr //= 2

    if rows_needed <= rr:
        # Single grid step: block extents equal the full (padded) array extents.
        rr = max(8, _round_up(rows_needed, 8))
        rows_total = rr
    else:
        rows_total = _round_up(rows_needed, rr)     # rr stays a multiple of 128
    return g, lane, rr, rows_total


def note_encoder_forward(note_tokens, note_durs, note_types,
                         emb_w, type_w, dur_w, dur_b):
    """Pallas TPU implementation of NoteEncoder.forward.

    Args:
      note_tokens: [B, T] int32 token ids in [0, n_vocab).
      note_durs:   [B, T] float durations.
      note_types:  [B, T] int32 type ids in [0, n_types).
      emb_w:       [n_vocab, H] token embedding table.
      type_w:      [n_types, H] type embedding table.
      dur_w:       [1, H] duration linear weight (Linear(1, H), transposed layout).
      dur_b:       [1, H] duration linear bias.
    Returns:
      [B, T, H] float32.
    """
    B, T = note_tokens.shape
    V, H = emb_w.shape
    NT = type_w.shape[0]
    scale = math.sqrt(H)

    n_tok = B * T
    v_tot = V + NT + 1                       # token band + type band + duration row
    v_pad = _round_up(v_tot, 8)

    G, L, Rr, rows_total = _choose_tiling(n_tok, H, v_pad)
    n_pad = rows_total * G

    # ---- constants built once in the wrapper (never re-materialised per step) ----
    w_full = jnp.zeros((v_pad, H), jnp.float32)
    w_full = w_full.at[:V].set(emb_w.astype(jnp.float32) * scale)
    w_full = w_full.at[V:V + NT].set(type_w.astype(jnp.float32) * scale)
    w_full = w_full.at[V + NT].set(dur_w.reshape(H).astype(jnp.float32))
    # Lane-shifted copies: lane group g lives in lanes [g*H, (g+1)*H) of the slab.
    w_shift = jnp.zeros((G, v_pad, L), jnp.float32)
    for g in range(G):
        w_shift = w_shift.at[g, :, g * H:(g + 1) * H].set(w_full)
    bias = jnp.tile(dur_b.reshape(1, H).astype(jnp.float32), (1, G))   # [1, L]

    # ---- flatten (B, T), pad to the tile grid, de-interleave into G bands ----
    tok = note_tokens.reshape(n_tok).astype(jnp.int32)
    typ = note_types.reshape(n_tok).astype(jnp.int32)
    dur = note_durs.reshape(n_tok).astype(jnp.float32)
    if n_pad != n_tok:
        pad = n_pad - n_tok
        tok = jnp.pad(tok, (0, pad))
        typ = jnp.pad(typ, (0, pad))
        dur = jnp.pad(dur, (0, pad))
    # [G, rows_total]; element [g, r] is flat token n = r*G + g.  Tiny int/f32
    # transposes — negligible next to the output write they make lane-dense.
    tok_t = tok.reshape(rows_total, G).T
    typ_t = typ.reshape(rows_total, G).T
    dur_t = dur.reshape(rows_total, G).T

    grid = (rows_total // Rr,)
    kernel = functools.partial(_note_encoder_kernel, n_vocab=V, n_types=NT)

    out_slab = pl.pallas_call(
        kernel,
        out_shape=jax.ShapeDtypeStruct((rows_total, L), jnp.float32),
        grid_spec=pltpu.PrefetchScalarGridSpec(
            num_scalar_prefetch=0,
            grid=grid,
            in_specs=[
                pl.BlockSpec((G, Rr), lambda i: (0, i)),            # token ids
                pl.BlockSpec((G, Rr), lambda i: (0, i)),            # type ids
                pl.BlockSpec((G, Rr), lambda i: (0, i)),            # durations
                # Constant-index blocks: Pallas only DMAs these once.  On v7x with a
                # large vocab, pipeline_mode=pl.Buffered(1) would also drop the
                # second (unused) buffer to save VMEM.
                pl.BlockSpec((G, v_pad, L), lambda i: (0, 0, 0)),   # fused table
                pl.BlockSpec((1, L), lambda i: (0, 0)),             # bias
            ],
            out_specs=pl.BlockSpec((Rr, L), lambda i: (i, 0)),
        ),
        compiler_params=pltpu.CompilerParams(
            dimension_semantics=("parallel",),      # shards rows across v7x's 2 TCs
            vmem_limit_bytes=32 * 1024 * 1024,
        ),
    )(tok_t, typ_t, dur_t, w_shift, bias)

    # The [rows_total, L] slab is bit-identical to the row-major [n_pad, H] layout,
    # so this reshape is free; only padded rows (if any) cost a slice.
    out = out_slab.reshape(n_pad, H)
    if n_pad != n_tok:
        out = out[:n_tok]
    return out.reshape(B, T, H)


def _reference(note_tokens, note_durs, note_types, emb_w, type_w, dur_w, dur_b):
    H = emb_w.shape[1]
    s = math.sqrt(H)
    x = emb_w[note_tokens] * s                                        # [B, T, H]
    t = type_w[note_types] * s                                        # [B, T, H]
    d = note_durs[..., None] * dur_w.reshape(H) + dur_b.reshape(H)    # [B, T, H]
    return x + t + d


if __name__ == "__main__":
    key = jax.random.PRNGKey(0)
    B, T, H = 2, 8, 32
    N_VOCAB, N_TYPES = 40, 5
    k1, k2, k3, k4, k5, k6, k7 = jax.random.split(key, 7)

    note_tokens = jax.random.randint(k1, (B, T), 0, N_VOCAB, dtype=jnp.int32)
    note_types = jax.random.randint(k2, (B, T), 0, N_TYPES, dtype=jnp.int32)
    note_durs = jax.random.uniform(k3, (B, T), dtype=jnp.float32) * 4.0

    emb_w = jax.random.normal(k4, (N_VOCAB, H), dtype=jnp.float32) * (H ** -0.5)
    type_w = jax.random.normal(k5, (N_TYPES, H), dtype=jnp.float32) * (H ** -0.5)
    dur_w = jax.random.normal(k6, (1, H), dtype=jnp.float32) * 0.1
    dur_b = jax.random.normal(k7, (1, H), dtype=jnp.float32) * 0.1

    out = note_encoder_forward(note_tokens, note_durs, note_types,
                               emb_w, type_w, dur_w, dur_b)
    out = jax.block_until_ready(out)

    ref = _reference(note_tokens, note_durs, note_types, emb_w, type_w, dur_w, dur_b)
    assert out.shape == (B, T, H), out.shape
    max_err = float(jnp.max(jnp.abs(out - ref)))
    assert jnp.allclose(out, ref, atol=1e-4, rtol=1e-4), max_err
    print("KERNEL_OK")
</pallas_src>

<mosaic_0001>
module attributes {stable_mosaic.version = 11 : i64} {
  func.func @_note_encoder_kernel(%arg0: i32, %arg1: memref<4x8xi32, #tpu.memory_space<vmem>>, %arg2: memref<4x8xi32, #tpu.memory_space<vmem>>, %arg3: memref<4x8xf32, #tpu.memory_space<vmem>>, %arg4: memref<4x48x128xf32, #tpu.memory_space<vmem>>, %arg5: memref<1x128xf32, #tpu.memory_space<vmem>>, %arg6: memref<8x128xf32, #tpu.memory_space<vmem>>) attributes {dimension_semantics = [#tpu.dimension_semantics<parallel>], iteration_bounds = array<i64: 1>, scalar_prefetch = 0 : i64, scratch_operands = 0 : i64, tpu.core_type = #tpu.core_type<tc>, window_params = [{transform_indices = @transform_0, window_bounds = array<i64: 4, 8>}, {transform_indices = @transform_1, window_bounds = array<i64: 4, 8>}, {transform_indices = @transform_2, window_bounds = array<i64: 4, 8>}, {pipeline_mode = #tpu.pipeline_mode<synchronous>, transform_indices = @transform_3, window_bounds = array<i64: 4, 48, 128>}, {pipeline_mode = #tpu.pipeline_mode<synchronous>, transform_indices = @transform_4, window_bounds = array<i64: 1, 128>}, {transform_indices = @transform_5, window_bounds = array<i64: 8, 128>}]} {
    %c0 = arith.constant 0 : index
    %c0_0 = arith.constant 0 : index
    %0 = vector.load %arg1[%c0, %c0_0] : memref<4x8xi32, #tpu.memory_space<vmem>>, vector<4x8xi32>
    %c0_1 = arith.constant 0 : index
    %c0_2 = arith.constant 0 : index
    %1 = vector.load %arg2[%c0_1, %c0_2] : memref<4x8xi32, #tpu.memory_space<vmem>>, vector<4x8xi32>
    %c0_3 = arith.constant 0 : index
    %c0_4 = arith.constant 0 : index
    %2 = vector.load %arg3[%c0_3, %c0_4] : memref<4x8xf32, #tpu.memory_space<vmem>>, vector<4x8xf32>
    %3 = tpu.iota {dimensions = array<i32: 0>} : vector<48x8xi32>
    %4 = vector.extract_strided_slice %0 {offsets = [0, 0], sizes = [1, 8], strides = [1, 1]} : vector<4x8xi32> to vector<1x8xi32>
    %5 = vector.extract_strided_slice %1 {offsets = [0, 0], sizes = [1, 8], strides = [1, 1]} : vector<4x8xi32> to vector<1x8xi32>
    %6 = vector.extract_strided_slice %2 {offsets = [0, 0], sizes = [1, 8], strides = [1, 1]} : vector<4x8xf32> to vector<1x8xf32>
    %7 = vector.broadcast %4 : vector<1x8xi32> to vector<48x8xi32>
    %8 = arith.cmpi eq, %3, %7 : vector<48x8xi32>
    %9 = arith.extui %8 : vector<48x8xi1> to vector<48x8xi32>
    %10 = arith.sitofp %9 : vector<48x8xi32> to vector<48x8xf32>
    %c40_i32 = arith.constant 40 : i32
    %11 = vector.broadcast %c40_i32 : i32 to vector<1x8xi32>
    %12 = arith.addi %5, %11 : vector<1x8xi32>
    %13 = vector.broadcast %12 : vector<1x8xi32> to vector<48x8xi32>
    %14 = arith.cmpi eq, %3, %13 : vector<48x8xi32>
    %15 = arith.extui %14 : vector<48x8xi1> to vector<48x8xi32>
    %16 = arith.sitofp %15 : vector<48x8xi32> to vector<48x8xf32>
    %17 = arith.addf %10, %16 : vector<48x8xf32>
    %c45_i32 = arith.constant 45 : i32
    %18 = vector.broadcast %c45_i32 : i32 to vector<48x8xi32>
    %19 = arith.cmpi eq, %3, %18 : vector<48x8xi32>
    %cst = arith.constant 0.000000e+00 : f32
    %20 = vector.shape_cast %6 : vector<1x8xf32> to vector<1x8xf32>
    %21 = vector.broadcast %20 : vector<1x8xf32> to vector<48x8xf32>
    %22 = vector.broadcast %cst : f32 to vector<48x8xf32>
    %23 = arith.select %19, %21, %22 : vector<48x8xi1>, vector<48x8xf32>
    %24 = arith.addf %17, %23 : vector<48x8xf32>
    %c0_5 = arith.constant 0 : index
    %c0_6 = arith.constant 0 : index
    %c0_7 = arith.constant 0 : index
    %25 = vector.load %arg4[%c0_5, %c0_6, %c0_7] : memref<4x48x128xf32, #tpu.memory_space<vmem>>, vector<1x48x128xf32>
    %26 = vector.shape_cast %25 : vector<1x48x128xf32> to vector<48x128xf32>
    %cst_8 = arith.constant dense<0.000000e+00> : vector<8x128xf32>
    %27 = tpu.matmul %24, %26, %cst_8 {dimension_numbers = #tpu.dot_dimension_numbers<[0], [0], [1], [1], [0, 1, 1, 1], [], []>} : vector<48x8xf32>, vector<48x128xf32>, vector<8x128xf32> -> vector<8x128xf32>
    %28 = vector.extract_strided_slice %0 {offsets = [1, 0], sizes = [1, 8], strides = [1, 1]} : vector<4x8xi32> to vector<1x8xi32>
    %29 = vector.extract_strided_slice %1 {offsets = [1, 0], sizes = [1, 8], strides = [1, 1]} : vector<4x8xi32> to vector<1x8xi32>
    %30 = vector.extract_strided_slice %2 {offsets = [1, 0], sizes = [1, 8], strides = [1, 1]} : vector<4x8xf32> to vector<1x8xf32>
    %31 = vector.broadcast %28 : vector<1x8xi32> to vector<48x8xi32>
    %32 = arith.cmpi eq, %3, %31 : vector<48x8xi32>
    %33 = arith.extui %32 : vector<48x8xi1> to vector<48x8xi32>
    %34 = arith.sitofp %33 : vector<48x8xi32> to vector<48x8xf32>
    %c40_i32_9 = arith.constant 40 : i32
    %35 = vector.broadcast %c40_i32_9 : i32 to vector<1x8xi32>
    %36 = arith.addi %29, %35 : vector<1x8xi32>
    %37 = vector.broadcast %36 : vector<1x8xi32> to vector<48x8xi32>
    %38 = arith.cmpi eq, %3, %37 : vector<48x8xi32>
    %39 = arith.extui %38 : vector<48x8xi1> to vector<48x8xi32>
    %40 = arith.sitofp %39 : vector<48x8xi32> to vector<48x8xf32>
    %41 = arith.addf %34, %40 : vector<48x8xf32>
    %c45_i32_10 = arith.constant 45 : i32
    %42 = vector.broadcast %c45_i32_10 : i32 to vector<48x8xi32>
    %43 = arith.cmpi eq, %3, %42 : vector<48x8xi32>
    %cst_11 = arith.constant 0.000000e+00 : f32
    %44 = vector.shape_cast %30 : vector<1x8xf32> to vector<1x8xf32>
    %45 = vector.broadcast %44 : vector<1x8xf32> to vector<48x8xf32>
    %46 = vector.broadcast %cst_11 : f32 to vector<48x8xf32>
    %47 = arith.select %43, %45, %46 : vector<48x8xi1>, vector<48x8xf32>
    %48 = arith.addf %41, %47 : vector<48x8xf32>
    %c1 = arith.constant 1 : index
    %c0_12 = arith.constant 0 : index
    %c0_13 = arith.constant 0 : index
    %49 = vector.load %arg4[%c1, %c0_12, %c0_13] : memref<4x48x128xf32, #tpu.memory_space<vmem>>, vector<1x48x128xf32>
    %50 = vector.shape_cast %49 : vector<1x48x128xf32> to vector<48x128xf32>
    %cst_14 = arith.constant dense<0.000000e+00> : vector<8x128xf32>
    %51 = tpu.matmul %48, %50, %cst_14 {dimension_numbers = #tpu.dot_dimension_numbers<[0], [0], [1], [1], [0, 1, 1, 1], [], []>} : vector<48x8xf32>, vector<48x128xf32>, vector<8x128xf32> -> vector<8x128xf32>
    %52 = arith.addf %27, %51 : vector<8x128xf32>
    %53 = vector.extract_strided_slice %0 {offsets = [2, 0], sizes = [1, 8], strides = [1, 1]} : vector<4x8xi32> to vector<1x8xi32>
    %54 = vector.extract_strided_slice %1 {offsets = [2, 0], sizes = [1, 8], strides = [1, 1]} : vector<4x8xi32> to vector<1x8xi32>
    %55 = vector.extract_strided_slice %2 {offsets = [2, 0], sizes = [1, 8], strides = [1, 1]} : vector<4x8xf32> to vector<1x8xf32>
    %56 = vector.broadcast %53 : vector<1x8xi32> to vector<48x8xi32>
    %57 = arith.cmpi eq, %3, %56 : vector<48x8xi32>
    %58 = arith.extui %57 : vector<48x8xi1> to vector<48x8xi32>
    %59 = arith.sitofp %58 : vector<48x8xi32> to vector<48x8xf32>
    %c40_i32_15 = arith.constant 40 : i32
    %60 = vector.broadcast %c40_i32_15 : i32 to vector<1x8xi32>
    %61 = arith.addi %54, %60 : vector<1x8xi32>
    %62 = vector.broadcast %61 : vector<1x8xi32> to vector<48x8xi32>
    %63 = arith.cmpi eq, %3, %62 : vector<48x8xi32>
    %64 = arith.extui %63 : vector<48x8xi1> to vector<48x8xi32>
    %65 = arith.sitofp %64 : vector<48x8xi32> to vector<48x8xf32>
    %66 = arith.addf %59, %65 : vector<48x8xf32>
    %c45_i32_16 = arith.constant 45 : i32
    %67 = vector.broadcast %c45_i32_16 : i32 to vector<48x8xi32>
    %68 = arith.cmpi eq, %3, %67 : vector<48x8xi32>
    %cst_17 = arith.constant 0.000000e+00 : f32
    %69 = vector.shape_cast %55 : vector<1x8xf32> to vector<1x8xf32>
    %70 = vector.broadcast %69 : vector<1x8xf32> to vector<48x8xf32>
    %71 = vector.broadcast %cst_17 : f32 to vector<48x8xf32>
    %72 = arith.select %68, %70, %71 : vector<48x8xi1>, vector<48x8xf32>
    %73 = arith.addf %66, %72 : vector<48x8xf32>
    %c2 = arith.constant 2 : index
    %c0_18 = arith.constant 0 : index
    %c0_19 = arith.constant 0 : index
    %74 = vector.load %arg4[%c2, %c0_18, %c0_19] : memref<4x48x128xf32, #tpu.memory_space<vmem>>, vector<1x48x128xf32>
    %75 = vector.shape_cast %74 : vector<1x48x128xf32> to vector<48x128xf32>
    %cst_20 = arith.constant dense<0.000000e+00> : vector<8x128xf32>
    %76 = tpu.matmul %73, %75, %cst_20 {dimension_numbers = #tpu.dot_dimension_numbers<[0], [0], [1], [1], [0, 1, 1, 1], [], []>} : vector<48x8xf32>, vector<48x128xf32>, vector<8x128xf32> -> vector<8x128xf32>
    %77 = arith.addf %52, %76 : vector<8x128xf32>
    %78 = vector.extract_strided_slice %0 {offsets = [3, 0], sizes = [1, 8], strides = [1, 1]} : vector<4x8xi32> to vector<1x8xi32>
    %79 = vector.extract_strided_slice %1 {offsets = [3, 0], sizes = [1, 8], strides = [1, 1]} : vector<4x8xi32> to vector<1x8xi32>
    %80 = vector.extract_strided_slice %2 {offsets = [3, 0], sizes = [1, 8], strides = [1, 1]} : vector<4x8xf32> to vector<1x8xf32>
    %81 = vector.broadcast %78 : vector<1x8xi32> to vector<48x8xi32>
    %82 = arith.cmpi eq, %3, %81 : vector<48x8xi32>
    %83 = arith.extui %82 : vector<48x8xi1> to vector<48x8xi32>
    %84 = arith.sitofp %83 : vector<48x8xi32> to vector<48x8xf32>
    %c40_i32_21 = arith.constant 40 : i32
    %85 = vector.broadcast %c40_i32_21 : i32 to vector<1x8xi32>
    %86 = arith.addi %79, %85 : vector<1x8xi32>
    %87 = vector.broadcast %86 : vector<1x8xi32> to vector<48x8xi32>
    %88 = arith.cmpi eq, %3, %87 : vector<48x8xi32>
    %89 = arith.extui %88 : vector<48x8xi1> to vector<48x8xi32>
    %90 = arith.sitofp %89 : vector<48x8xi32> to vector<48x8xf32>
    %91 = arith.addf %84, %90 : vector<48x8xf32>
    %c45_i32_22 = arith.constant 45 : i32
    %92 = vector.broadcast %c45_i32_22 : i32 to vector<48x8xi32>
    %93 = arith.cmpi eq, %3, %92 : vector<48x8xi32>
    %cst_23 = arith.constant 0.000000e+00 : f32
    %94 = vector.shape_cast %80 : vector<1x8xf32> to vector<1x8xf32>
    %95 = vector.broadcast %94 : vector<1x8xf32> to vector<48x8xf32>
    %96 = vector.broadcast %cst_23 : f32 to vector<48x8xf32>
    %97 = arith.select %93, %95, %96 : vector<48x8xi1>, vector<48x8xf32>
    %98 = arith.addf %91, %97 : vector<48x8xf32>
    %c3 = arith.constant 3 : index
    %c0_24 = arith.constant 0 : index
    %c0_25 = arith.constant 0 : index
    %99 = vector.load %arg4[%c3, %c0_24, %c0_25] : memref<4x48x128xf32, #tpu.memory_space<vmem>>, vector<1x48x128xf32>
    %100 = vector.shape_cast %99 : vector<1x48x128xf32> to vector<48x128xf32>
    %cst_26 = arith.constant dense<0.000000e+00> : vector<8x128xf32>
    %101 = tpu.matmul %98, %100, %cst_26 {dimension_numbers = #tpu.dot_dimension_numbers<[0], [0], [1], [1], [0, 1, 1, 1], [], []>} : vector<48x8xf32>, vector<48x128xf32>, vector<8x128xf32> -> vector<8x128xf32>
    %102 = arith.addf %77, %101 : vector<8x128xf32>
    %c0_27 = arith.constant 0 : index
    %c0_28 = arith.constant 0 : index
    %103 = vector.load %arg5[%c0_27, %c0_28] : memref<1x128xf32, #tpu.memory_space<vmem>>, vector<1x128xf32>
    %104 = vector.broadcast %103 : vector<1x128xf32> to vector<8x128xf32>
    %105 = arith.addf %102, %104 : vector<8x128xf32>
    %c0_29 = arith.constant 0 : index
    %c0_30 = arith.constant 0 : index
    %106 = vector.load %arg6[%c0_29, %c0_30] : memref<8x128xf32, #tpu.memory_space<vmem>>, vector<8x128xf32>
    tpu.vector_store %arg6[%c0_29, %c0_30], %105 {strides = array<i32>} : memref<8x128xf32, #tpu.memory_space<vmem>>, vector<8x128xf32>,
    return
  }
  func.func @transform_0(%arg0: i32) -> (i32, i32) {
    %c0_i32 = arith.constant 0 : i32
    %c0_i32_0 = arith.constant 0 : i32
    return %c0_i32, %arg0 : i32, i32
  }
  func.func @transform_1(%arg0: i32) -> (i32, i32) {
    %c0_i32 = arith.constant 0 : i32
    %c0_i32_0 = arith.constant 0 : i32
    return %c0_i32, %arg0 : i32, i32
  }
  func.func @transform_2(%arg0: i32) -> (i32, i32) {
    %c0_i32 = arith.constant 0 : i32
    %c0_i32_0 = arith.constant 0 : i32
    return %c0_i32, %arg0 : i32, i32
  }
  func.func @transform_3(%arg0: i32) -> (i32, i32, i32) {
    %c0_i32 = arith.constant 0 : i32
    %c0_i32_0 = arith.constant 0 : i32
    %c0_i32_1 = arith.constant 0 : i32
    %c0_i32_2 = arith.constant 0 : i32
    return %c0_i32, %c0_i32_0, %c0_i32_1 : i32, i32, i32
  }
  func.func @transform_4(%arg0: i32) -> (i32, i32) {
    %c0_i32 = arith.constant 0 : i32
    %c0_i32_0 = arith.constant 0 : i32
    %c0_i32_1 = arith.constant 0 : i32
    return %c0_i32, %c0_i32_0 : i32, i32
  }
  func.func @transform_5(%arg0: i32) -> (i32, i32) {
    %c0_i32 = arith.constant 0 : i32
    %c0_i32_0 = arith.constant 0 : i32
    return %arg0, %c0_i32 : i32, i32
  }
}

</mosaic_0001>

<bundles_post_ra>
// kernel: tpu_custom_call.1
= control target key start
LH: loop header
LB: loop body
LE: loop exit
PB: predicated region body
PF: predicated region fallthrough
CT: control target
= control target key end

     0   :  { %10 = vsyncpa [#allocation3], 0  ;;  %s1418_s0 = inlined_call_operand.hbm [shape: s32[4,8], index: 0, kind: input, shape index: {}]   ;;  %s1419_s1 = inlined_call_operand.hbm [shape: s32[4,8], index: 1, kind: input, shape index: {}]   ;;  %s1420_s2 = inlined_call_operand.hbm [shape: f32[4,8], index: 2, kind: input, shape index: {}]   ;;  %s1421_s3 = inlined_call_operand.hbm [shape: f32[4,48,128], index: 3, kind: input, shape index: {}]   ;;  %s1422_s4 = inlined_call_operand.vmem [shape: f32[1,128], index: 4, kind: input, shape index: {}]   ;;  %s1423_s5 = inlined_call_operand.hbm [shape: f32[8,128], index: 5, kind: output, shape index: {}]  }
   0x1   :  { %11 = vsyncpa [#allocation6], 0 }
   0x2   :  { %12 = vsyncpa [#allocation9], 0 }
   0x3   :  { %13 = vsyncpa [#allocation4], 0  ;;  %s1085_s18 = smov [#allocation5]   ;;  %s1086_s20 = smov [#allocation2]  }
   0x4   :  { %s30_s19 = sshll.u32 %s1085_s18, 4  ;;  %s20_s21 = sshll.u32 %s1086_s20, 4  ;;  %s31_s19 = int_to_ptr.vmem [resolvable:$true] %s30_s19  ;;  %s21_s21 = int_to_ptr.vmem [resolvable:$true] %s20_s21 }
   0x5   :  { %s985_s22 = scalar_lea.vmem %s31_s19, 64  ;;  %p990_p1 = scmp.lt.s32.totalorder %s31_s19, %s31_s19 }
   0x6   :  { %p986_p0 = scmp.ne.s32.totalorder %s31_s19, %s985_s22  ;;  %p991_p2 = scmp.lt.s32.totalorder %s985_s22, %s985_s22 }
   0x8   :  { %p992_p3 = por %p991_p2, %p990_p1 }
   0xa   :  { %p993_p4 = pnand %p992_p3, %p986_p0 }
   0xc   :  { %996 = shalt.err (!%p993_p4)
}
   0xd   :  { %33 = dma.hbm_to_vmem [thread:$0]  %s1419_s1, 64, %s31_s19, [#allocation6]  }
   0xe   :  { %s1005_s25 = scalar_lea.vmem %s21_s21, 64  ;;  %p1010_p6 = scmp.lt.s32.totalorder %s21_s21, %s21_s21 }
   0xf   :  { %p1006_p5 = scmp.ne.s32.totalorder %s21_s21, %s1005_s25  ;;  %p1011_p7 = scmp.lt.s32.totalorder %s1005_s25, %s1005_s25 }
  0x11   :  { %p1012_p8 = por %p1011_p7, %p1010_p6 }
  0x13   :  { %p1013_p9 = pnand %p1012_p8, %p1006_p5 }
  0x15   :  { %1016 = shalt.err (!%p1013_p9)
}
  0x16   :  { %23 = dma.hbm_to_vmem [thread:$0]  %s1418_s0, 64, %s21_s21, [#allocation3]  }
  0x17   :  { %s1087_s28 = smov [#allocation7]   ;;  %s1088_s30 = smov [#allocation8]  }
  0x18   :  { %s40_s29 = sshll.u32 %s1087_s28, 4  ;;  %s49_s6 = sshll.u32 %s1088_s30, 4  ;;  %s41_s29 = int_to_ptr.vmem [resolvable:$true] %s40_s29  ;;  %s50_s6 = int_to_ptr.vmem [resolvable:$true] %s49_s6 }
  0x19   :  { %s1025_s7 = scalar_lea.vmem %s41_s29, 64  ;;  %p1030_p11 = scmp.lt.s32.totalorder %s41_s29, %s41_s29 }
  0x1a   :  { %p1026_p10 = scmp.ne.s32.totalorder %s41_s29, %s1025_s7  ;;  %p1031_p12 = scmp.lt.s32.totalorder %s1025_s7, %s1025_s7 }
  0x1c   :  { %p1032_p13 = por %p1031_p12, %p1030_p11 }
  0x1e   :  { %p1033_p0 = pnand %p1032_p13, %p1026_p10 }
  0x20   :  { %1036 = shalt.err (!%p1033_p0)
}
  0x21   :  { %43 = dma.hbm_to_vmem [thread:$0]  %s1420_s2, 64, %s41_s29, [#allocation6]  }
  0x22   :  { %s1045_s9 = scalar_lea.vmem %s50_s6, 3072  ;;  %p1050_p2 = scmp.lt.s32.totalorder %s50_s6, %s50_s6 }
  0x23   :  { %p1046_p1 = scmp.ne.s32.totalorder %s50_s6, %s1045_s9  ;;  %p1051_p3 = scmp.lt.s32.totalorder %s1045_s9, %s1045_s9 }
  0x25   :  { %p1052_p4 = por %p1051_p3, %p1050_p2 }
  0x27   :  { %p1053_p5 = pnand %p1052_p4, %p1046_p1 }
  0x29   :  { %1056 = shalt.err (!%p1053_p5)
}
  0x2a   :  { %s1089_s0 = smov 128   ;;  %s1090_s10 = smov 8  }
  0x2b   :  { %55 = dma.hbm_to_vmem [thread:$0]  %s1421_s3, 3072, %s50_s6, [#allocation9], %s1089_s0, %s1089_s0, %s1090_s10  }
  0x2c   :  { %1077 = dma.done.wait [#allocation3], 64  }
  0x2d   :  { %1078 = vsyncadd [#allocation3], 4294967232 }
  0x2e   :  { %1079 = dma.done.wait [#allocation6], 128  }
  0x2f   :  { %1080 = vsyncadd [#allocation6], 4294967168 }
  0x30   :  { %1081 = dma.done.wait [#allocation9], 3072  }
  0x31   :  { %1082 = vsyncadd [#allocation9], 4294964224  ;;  %v73_v0 = vlaneseq  ;;  %v1091_v1 = vmov 0.0   ;;  %vm1092_vm0 = vmmov 0   ;;  %v1150_v5 = vld [vmem:[#allocation2] sm:$0xf] }
  0x32   :  { %908 = vmatprep.subr.mxu0 %v1091_v1  ;;  %923 = vmatprep.subr.mxu1 %v1091_v1  ;;  %v71_v6 = vld [vmem:[#allocation5] sm:$0xf]  ;;  %v158_v12 = vld [vmem:[#allocation8 + $0x28] sm:$0xff]  ;;  %v230_v13 = vld [vmem:[#allocation8 + $0x50] sm:$0xff]  ;;  %s1093_s13 = smov [#allocation10]  }
  0x33   :  { %v1138_v2 = vshrl.u32 %v73_v0, 7  ;;  %920 = vmatprep.mubr.msk.f32.mxu0 %vm1092_vm0, %v1091_v1  ;;  %935 = vmatprep.mubr.msk.f32.mxu1 %vm1092_vm0, %v1091_v1  ;;  %v1155_v8 = vadd.s32 40, %v71_v6  ;;  %v231_v11 = vld [vmem:[#allocation8 + $0x58] sm:$0xff]  ;;  %v157_v20 = vld [vmem:[#allocation8 + $0x20] sm:$0xff]  ;;  %v229_v21 = vld [vmem:[#allocation8 + $0x48] sm:$0xff]  ;;  %s816_s14 = sshll.u32 %s1093_s13, 4  ;;  %s817_s14 = int_to_ptr.vmem [resolvable:$true] %s816_s14 }
  0x34   :  { %909 = vmatpush3.msra.mxu0 %v231_v11  ;;  %924 = vmatpush3.msra.mxu1 %v158_v12  ;;  %v156_v25 = vld [vmem:[#allocation8 + $0x18] sm:$0xff]  ;;  %v228_v33 = vld [vmem:[#allocation8 + $0x40] sm:$0xff]  ;;  %v155_v35 = vld [vmem:[#allocation8 + $0x10] sm:$0xff]  ;;  %s1057_s15 = scalar_lea.vmem %s817_s14, 128  ;;  %p1062_p7 = scmp.lt.s32.totalorder %s817_s14, %s817_s14 }
  0x35   :  { %v1145_v3 = vsub.s32 1, %v1138_v2  ;;  %v1148_v4 = vsub.s32 0, %v1138_v2  ;;  %v1153_v7 = vadd.s32 8, %v1138_v2  ;;  %v1166_v14 = vadd.s32 16, %v1138_v2  ;;  %910 = vmatprep.subr.mxu0 %v1091_v1  ;;  %925 = vmatprep.subr.mxu1 %v1091_v1  ;;  %v227_v40 = vld [vmem:[#allocation8 + $0x38] sm:$0xff]  ;;  %v154_v49 = vld [vmem:[#allocation8 + $0x8] sm:$0xff]  ;;  %p1058_p6 = scmp.ne.s32.totalorder %s817_s14, %s1057_s15  ;;  %p1063_p8 = scmp.lt.s32.totalorder %s1057_s15, %s1057_s15 }
  0x36   :  { %v1169_v15 = vadd.s32 24, %v1138_v2  ;;  %v1172_v16 = vadd.s32 32, %v1138_v2  ;;  %v1175_v17 = vadd.s32 40, %v1138_v2  ;;  %911 = vmatpush3.msra.mxu0 %v230_v13  ;;  %926 = vmatpush3.msra.mxu1 %v157_v20  ;;  %v1230_v41 = vsub.s32 2, %v1138_v2  ;;  %v1235_v44 = vld [vmem:[#allocation7] sm:$0xf] }
  0x37   :  { %v1159_v9 = vrot.slane %v1150_v5, %v1145_v3  ;;  %v1163_v10 = vrot.slane %v1150_v5, %v1148_v4  ;;  %v1181_v18 = vrot.slane %v1155_v8, %v1145_v3  ;;  %v1187_v19 = vrot.slane %v1155_v8, %v1148_v4  ;;  %912 = vmatprep.subr.mxu0 %v1091_v1  ;;  %v226_v52 = vld [vmem:[#allocation8 + $0x30] sm:$0xff]  ;;  %v153_v56 = vld [vmem:[#allocation8] sm:$0xff]  ;;  %p1064_p9 = por %p1063_p8, %p1062_p7 }
  0x38   :  { %913 = vmatpush3.msra.mxu0 %v229_v21  ;;  %927 = vmatprep.subr.mxu1 %v1091_v1  ;;  %v1238_v45 = vsub.s32 3, %v1138_v2  ;;  %v212_v53 = vrot.slane %v1235_v44, %v1145_v3  ;;  %v140_v54 = vrot.slane %v1235_v44, %v1148_v4  ;;  %v1269_v55 = vrot.slane %v1150_v5, %v1230_v41 }
  0x39   :  { %vm163_vm1 = vcmp.eq.s32.totalorder %v1138_v2, %v1159_v9  ;;  %vm84_vm2 = vcmp.eq.s32.totalorder %v1138_v2, %v1163_v10  ;;  %vm164_vm3 = vcmp.eq.s32.totalorder %v1153_v7, %v1159_v9  ;;  %vm85_vm4 = vcmp.eq.s32.totalorder %v1153_v7, %v1163_v10  ;;  %914 = vmatprep.subr.mxu0 %v1091_v1  ;;  %p1065_p10 = pnand %p1064_p9, %p1058_p6 }
  0x3a   :  { %v839_v22 = vsel %vm163_vm1, 1.0, %v1091_v1  ;;  %v827_v23 = vsel %vm84_vm2, 1.0, %v1091_v1  ;;  %vm185_vm5 = vcmp.eq.s32.totalorder %v1138_v2, %v1181_v18  ;;  %vm107_vm6 = vcmp.eq.s32.totalorder %v1138_v2, %v1187_v19  ;;  %928 = vmatpush3.msra.mxu1 %v156_v25  ;;  %915 = vmatpush3.msra.mxu0 %v228_v33 }
  0x3b   :  { %v840_v24 = vsel %vm164_vm3, 1.0, %v1091_v1  ;;  %vm186_vm7 = vcmp.eq.s32.totalorder %v1153_v7, %v1181_v18  ;;  %v845_v26 = vsel %vm185_vm5, 1.0, %v1091_v1  ;;  %v833_v27 = vsel %vm107_vm6, 1.0, %v1091_v1  ;;  %929 = vmatprep.subr.mxu1 %v1091_v1  ;;  %916 = vmatprep.subr.mxu0 %v1091_v1 }
  0x3c   :  { %v846_v28 = vsel %vm186_vm7, 1.0, %v1091_v1  ;;  %v828_v29 = vsel %vm85_vm4, 1.0, %v1091_v1  ;;  %v203_v30 = vadd.f32 %v845_v26, %v839_v22  ;;  %v125_v31 = vadd.f32 %v833_v27, %v827_v23  ;;  %930 = vmatpush3.msra.mxu1 %v155_v35  ;;  %917 = vmatpush3.msra.mxu0 %v227_v40 }
  0x3d   :  { %v204_v32 = vadd.f32 %v846_v28, %v840_v24  ;;  %vm108_vm8 = vcmp.eq.s32.totalorder %v1153_v7, %v1187_v19  ;;  %vm165_vm9 = vcmp.eq.s32.totalorder %v1166_v14, %v1159_v9  ;;  %vm187_vm10 = vcmp.eq.s32.totalorder %v1166_v14, %v1181_v18  ;;  %931 = vmatprep.subr.mxu1 %v1091_v1 }
  0x3e   :  { %v834_v34 = vsel %vm108_vm8, 1.0, %v1091_v1  ;;  %vm86_vm11 = vcmp.eq.s32.totalorder %v1166_v14, %v1163_v10  ;;  %232 = vxpose.xlu0.b32.start [1/6] (short) (narrow) %v203_v30, 8  ;;  %338 = vxpose.xlu1.b32.start [1/6] (short) (narrow) %v125_v31, 8  ;;  %v841_v37 = vsel %vm165_vm9, 1.0, %v1091_v1  ;;  %v847_v38 = vsel %vm187_vm10, 1.0, %v1091_v1 }
  0x3f   :  { %v126_v36 = vadd.f32 %v834_v34, %v828_v29  ;;  %v829_v39 = vsel %vm86_vm11, 1.0, %v1091_v1  ;;  %vm109_vm12 = vcmp.eq.s32.totalorder %v1166_v14, %v1187_v19  ;;  %vm166_vm13 = vcmp.eq.s32.totalorder %v1169_v15, %v1159_v9  ;;  %918 = vmatprep.subr.mxu0 %v1091_v1  ;;  %932 = vmatpush3.msra.mxu1 %v154_v49 }
  0x40   :  { %vm188_vm14 = vcmp.eq.s32.totalorder %v1169_v15, %v1181_v18  ;;  %v205_v42 = vadd.f32 %v847_v38, %v841_v37  ;;  %v835_v43 = vsel %vm109_vm12, 1.0, %v1091_v1  ;;  %vm87_vm15 = vcmp.eq.s32.totalorder %v1169_v15, %v1163_v10  ;;  %919 = vmatpush3.msra.mxu0 %v226_v52  ;;  %933 = vmatprep.subr.mxu1 %v1091_v1 }
  0x41   :  { %v127_v46 = vadd.f32 %v835_v43, %v829_v39  ;;  %v842_v47 = vsel %vm166_vm13, 1.0, %v1091_v1  ;;  %v848_v48 = vsel %vm188_vm14, 1.0, %v1091_v1  ;;  %vm110_vm1 = vcmp.eq.s32.totalorder %v1169_v15, %v1187_v19  ;;  %934 = vmatpush3.msra.mxu1 %v153_v56  ;;  %938 = vmatprep.subr.mxu0 %v1091_v1 }
  0x42   :  { %233 = vxpose.xlu0.b32.cont [2/6] (short) (narrow) %v204_v32, 8  ;;  %339 = vxpose.xlu1.b32.cont [2/6] (short) (narrow) %v126_v36, 8  ;;  %v830_v50 = vsel %vm87_vm15, 1.0, %v1091_v1  ;;  %v836_v51 = vsel %vm110_vm1, 1.0, %v1091_v1  ;;  %vm167_vm2 = vcmp.eq.s32.totalorder %v1172_v16, %v1159_v9  ;;  %vm189_vm3 = vcmp.eq.s32.totalorder %v1172_v16, %v1181_v18 }
  0x43   :  { %vm88_vm4 = vcmp.eq.s32.totalorder %v1172_v16, %v1163_v10  ;;  %vm136_vm5 = vcmp.eq.s32.totalorder %v1175_v17, 45  ;;  %vm111_vm6 = vcmp.eq.s32.totalorder %v1172_v16, %v1187_v19  ;;  %vm168_vm7 = vcmp.eq.s32.totalorder %v1175_v17, %v1159_v9  ;;  %953 = vmatprep.subr.mxu1 %v1091_v1 }
  0x44   :  { %vm190_vm8 = vcmp.eq.s32.totalorder %v1175_v17, %v1181_v18  ;;  %v206_v57 = vadd.f32 %v848_v48, %v842_v47  ;;  %v128_v58 = vadd.f32 %v836_v51, %v830_v50  ;;  %v843_v59 = vsel %vm167_vm2, 1.0, %v1091_v1 }
  0x45   :  { %v849_v60 = vsel %vm189_vm3, 1.0, %v1091_v1  ;;  %v831_v61 = vsel %vm88_vm4, 1.0, %v1091_v1  ;;  %v844_v62 = vsel %vm168_vm7, 1.0, %v1091_v1  ;;  %v850_v63 = vsel %vm190_vm8, 1.0, %v1091_v1 }
  0x46   :  { %234 = vxpose.xlu0.b32.cont [3/6] (short) (narrow) %v205_v42, 8  ;;  %340 = vxpose.xlu1.b32.cont [3/6] (short) (narrow) %v127_v46, 8  ;;  %vm89_vm9 = vcmp.eq.s32.totalorder %v1175_v17, %v1163_v10  ;;  %v837_v0 = vsel %vm111_vm6, 1.0, %v1091_v1  ;;  %vm112_vm10 = vcmp.eq.s32.totalorder %v1175_v17, %v1187_v19  ;;  %v1297_v4 = vrot.slane %v1155_v8, %v1230_v41 }
  0x47   :  { %v832_v3 = vsel %vm89_vm9, 1.0, %v1091_v1  ;;  %v838_v6 = vsel %vm112_vm10, 1.0, %v1091_v1  ;;  %v1303_v9 = vrot.slane %v1150_v5, %v1238_v45  ;;  %v207_v10 = vadd.f32 %v849_v60, %v843_v59 }
  0x48   :  { %v208_v11 = vadd.f32 %v850_v63, %v844_v62  ;;  %v1308_v12 = vrot.slane %v1155_v8, %v1238_v45  ;;  %v129_v13 = vadd.f32 %v837_v0, %v831_v61  ;;  %v218_v18 = vsel %vm136_vm5, %v212_v53, 0.0  ;;  %v514_v62 = vld [vmem:[#allocation8 + $0x80] sm:$0xff]  ;;  %v693_v63 = vld [vmem:[#allocation8 + $0xb0] sm:$0xff]  ;;  %v692_v0 = vld [vmem:[#allocation8 + $0xa8] sm:$0xff] }
  0x49   :  { %v130_v19 = vadd.f32 %v838_v6, %v832_v3  ;;  %vm447_vm11 = vcmp.eq.s32.totalorder %v1138_v2, %v1269_v55  ;;  %v146_v5 = vsel %vm136_vm5, %v140_v54, 0.0  ;;  %vm469_vm12 = vcmp.eq.s32.totalorder %v1138_v2, %v1297_v4  ;;  %v512_v3 = vld [vmem:[#allocation8 + $0x70] sm:$0xff]  ;;  %v511_v6 = vld [vmem:[#allocation8 + $0x68] sm:$0xff] }
  0x4a   :  { %235 = vxpose.xlu0.b32.cont [4/6] (short) (narrow) %v206_v57, 8  ;;  %341 = vxpose.xlu1.b32.cont [4/6] (short) (narrow) %v128_v58, 8  ;;  %vm626_vm13 = vcmp.eq.s32.totalorder %v1138_v2, %v1303_v9  ;;  %vm648_vm14 = vcmp.eq.s32.totalorder %v1138_v2, %v1308_v12  ;;  %v224_v8 = vadd.f32 %v218_v18, %v208_v11  ;;  %v853_v20 = vsel %vm447_vm11, 1.0, %v1091_v1  ;;  %v689_v11 = vld [vmem:[#allocation8 + $0x90] sm:$0xff] }
  0x4b   :  { %vm448_vm15 = vcmp.eq.s32.totalorder %v1153_v7, %v1269_v55  ;;  %v152_v21 = vadd.f32 %v146_v5, %v130_v19  ;;  %v859_v22 = vsel %vm469_vm12, 1.0, %v1091_v1  ;;  %vm470_vm1 = vcmp.eq.s32.totalorder %v1153_v7, %v1297_v4 }
  0x4c   :  { %vm627_vm2 = vcmp.eq.s32.totalorder %v1153_v7, %v1303_v9  ;;  %v866_v23 = vsel %vm626_vm13, 1.0, %v1091_v1  ;;  %v872_v2 = vsel %vm648_vm14, 1.0, %v1091_v1  ;;  %vm649_vm3 = vcmp.eq.s32.totalorder %v1153_v7, %v1308_v12 }
  0x4d   :  { %v487_v24 = vadd.f32 %v859_v22, %v853_v20  ;;  %v854_v25 = vsel %vm448_vm15, 1.0, %v1091_v1  ;;  %v860_v26 = vsel %vm470_vm1, 1.0, %v1091_v1  ;;  %v867_v27 = vsel %vm627_vm2, 1.0, %v1091_v1 }
  0x4e   :  { %236 = vxpose.xlu0.b32.cont [5/6] (short) (narrow) %v207_v10, 8  ;;  %342 = vxpose.xlu1.b32.cont [5/6] (short) (narrow) %v129_v13, 8  ;;  %v666_v28 = vadd.f32 %v872_v2, %v866_v23  ;;  %v873_v29 = vsel %vm649_vm3, 1.0, %v1091_v1  ;;  %vm449_vm4 = vcmp.eq.s32.totalorder %v1166_v14, %v1269_v55  ;;  %vm471_vm6 = vcmp.eq.s32.totalorder %v1166_v14, %v1297_v4  ;;  %v510_v10 = vld [vmem:[#allocation8 + $0x60] sm:$0xff]  ;;  %v879_v2 = vld [vmem:[%s1422_s4] ss:$0 sm:$0xff] }
  0x4f   :  { %vm628_vm7 = vcmp.eq.s32.totalorder %v1166_v14, %v1303_v9  ;;  %vm650_vm8 = vcmp.eq.s32.totalorder %v1166_v14, %v1308_v12  ;;  %v488_v7 = vadd.f32 %v860_v26, %v854_v25  ;;  %v667_v30 = vadd.f32 %v873_v29, %v867_v27 }
  0x50   :  { %v855_v31 = vsel %vm449_vm4, 1.0, %v1091_v1  ;;  %v861_v32 = vsel %vm471_vm6, 1.0, %v1091_v1  ;;  %v868_v33 = vsel %vm628_vm7, 1.0, %v1091_v1  ;;  %v874_v34 = vsel %vm650_vm8, 1.0, %v1091_v1 }
  0x51   :  { %vm450_vm9 = vcmp.eq.s32.totalorder %v1169_v15, %v1269_v55  ;;  %vm472_vm10 = vcmp.eq.s32.totalorder %v1169_v15, %v1297_v4  ;;  %vm629_vm11 = vcmp.eq.s32.totalorder %v1169_v15, %v1303_v9  ;;  %vm651_vm12 = vcmp.eq.s32.totalorder %v1169_v15, %v1308_v12 }
  0x52   :  { %237 = vxpose.xlu0.b32.end [6/6] (short) (narrow) %v224_v8, 8  ;;  %343 = vxpose.xlu1.b32.end [6/6] (short) (narrow) %v152_v21, 8  ;;  %v489_v14 = vadd.f32 %v861_v32, %v855_v31  ;;  %v668_v35 = vadd.f32 %v874_v34, %v868_v33  ;;  %v856_v36 = vsel %vm450_vm9, 1.0, %v1091_v1  ;;  %v862_v37 = vsel %vm472_vm10, 1.0, %v1091_v1 }
  0x53   :  { %v869_v38 = vsel %vm629_vm11, 1.0, %v1091_v1  ;;  %v875_v39 = vsel %vm651_vm12, 1.0, %v1091_v1  ;;  %vm451_vm13 = vcmp.eq.s32.totalorder %v1172_v16, %v1269_v55  ;;  %vm473_vm14 = vcmp.eq.s32.totalorder %v1172_v16, %v1297_v4 }
  0x54   :  { %vm630_vm15 = vcmp.eq.s32.totalorder %v1172_v16, %v1303_v9  ;;  %vm652_vm1 = vcmp.eq.s32.totalorder %v1172_v16, %v1308_v12  ;;  %vm452_vm2 = vcmp.eq.s32.totalorder %v1175_v17, %v1269_v55  ;;  %vm474_vm3 = vcmp.eq.s32.totalorder %v1175_v17, %v1297_v4  ;;  %v691_v4 = vld [vmem:[#allocation8 + $0xa0] sm:$0xff] }
  0x55   :  { %vm631_vm4 = vcmp.eq.s32.totalorder %v1175_v17, %v1303_v9  ;;  %vm653_vm6 = vcmp.eq.s32.totalorder %v1175_v17, %v1308_v12  ;;  %v490_v15 = vadd.f32 %v862_v37, %v856_v36  ;;  %v669_v40 = vadd.f32 %v875_v39, %v869_v38  ;;  %v513_v17 = vld [vmem:[#allocation8 + $0x78] sm:$0xff] }
  0x56   :  { %516 = vxpose.xlu0.b32.start [1/6] (short) (narrow) %v487_v24, 8  ;;  %695 = vxpose.xlu1.b32.start [1/6] (short) (narrow) %v666_v28, 8  ;;  %v857_v42 = vsel %vm451_vm13, 1.0, %v1091_v1  ;;  %v863_v43 = vsel %vm473_vm14, 1.0, %v1091_v1  ;;  %v870_v16 = vsel %vm630_vm15, 1.0, %v1091_v1  ;;  %v876_v46 = vsel %vm652_vm1, 1.0, %v1091_v1 }
  0x57   :  { %v858_v47 = vsel %vm452_vm2, 1.0, %v1091_v1  ;;  %v864_v48 = vsel %vm474_vm3, 1.0, %v1091_v1  ;;  %v496_v49 = vrot.slane %v1235_v44, %v1230_v41  ;;  %v871_v50 = vsel %vm631_vm4, 1.0, %v1091_v1  ;;  %v690_v9 = vld [vmem:[#allocation8 + $0x98] sm:$0xff] }
  0x58   :  { %v877_v51 = vsel %vm653_vm6, 1.0, %v1091_v1  ;;  %v675_v52 = vrot.slane %v1235_v44, %v1238_v45  ;;  %v491_v53 = vadd.f32 %v863_v43, %v857_v42  ;;  %v670_v54 = vadd.f32 %v876_v46, %v870_v16  ;;  %v515_v44 = vld [vmem:[#allocation8 + $0x88] sm:$0xff]  ;;  %v694_v45 = vld [vmem:[#allocation8 + $0xb8] sm:$0xff] }
  0x59   :  { %v492_v55 = vadd.f32 %v864_v48, %v858_v47  ;;  %v671_v56 = vadd.f32 %v877_v51, %v871_v50  ;;  %v502_v57 = vsel %vm136_vm5, %v496_v49, 0.0  ;;  %vm264_vm7 = vcmask 392192  }
  0x5a   :  { %517 = vxpose.xlu0.b32.cont [2/6] (short) (narrow) %v488_v7, 8  ;;  %696 = vxpose.xlu1.b32.cont [2/6] (short) (narrow) %v667_v30, 8  ;;  %v681_v58 = vsel %vm136_vm5, %v675_v52, 0.0 }
  0x5b   :  { %v508_v41 = vadd.f32 %v502_v57, %v492_v55  ;;  %v687_v59 = vadd.f32 %v681_v58, %v671_v56 }
  0x5e   :  { %518 = vxpose.xlu0.b32.cont [3/6] (short) (narrow) %v489_v14, 8  ;;  %697 = vxpose.xlu1.b32.cont [3/6] (short) (narrow) %v668_v35, 8 }
  0x62   :  { %519 = vxpose.xlu0.b32.cont [4/6] (short) (narrow) %v490_v15, 8  ;;  %698 = vxpose.xlu1.b32.cont [4/6] (short) (narrow) %v669_v40, 8 }
  0x66   :  { %520 = vxpose.xlu0.b32.cont [5/6] (short) (narrow) %v491_v53, 8  ;;  %699 = vxpose.xlu1.b32.cont [5/6] (short) (narrow) %v670_v54, 8 }
  0x6a   :  { %521 = vxpose.xlu0.b32.end [6/6] (short) (narrow) %v508_v41, 8  ;;  %700 = vxpose.xlu1.b32.end [6/6] (short) (narrow) %v687_v59, 8 }
  0xba   :  { %v248_v60 = vpop.trf.xlu0  ;;  %v354_v61 = vpop.trf.xlu1 }
  0xbb   :  { %921 = vmatmul.mubr.msk.f32.vlgmr.msra.gmra.mxu0 %vm264_vm7, %v248_v60  ;;  %936 = vmatmul.mubr.msk.f32.vlgmr.msra.gmra.mxu1 %vm264_vm7, %v354_v61 }
  0xbc   :  { %939 = vmatpush3.msra.mxu0 %v515_v44  ;;  %954 = vmatpush3.msra.mxu1 %v694_v45 }
  0xbd   :  { %940 = vmatprep.subr.mxu0 %v1091_v1  ;;  %955 = vmatprep.subr.mxu1 %v1091_v1 }
  0xbe   :  { %941 = vmatpush3.msra.mxu0 %v514_v62  ;;  %956 = vmatpush3.msra.mxu1 %v693_v63 }
  0xbf   :  { %942 = vmatprep.subr.mxu0 %v1091_v1  ;;  %957 = vmatprep.subr.mxu1 %v1091_v1 }
  0xc0   :  { %943 = vmatpush3.msra.mxu0 %v513_v17  ;;  %958 = vmatpush3.msra.mxu1 %v692_v0 }
  0xc1   :  { %944 = vmatprep.subr.mxu0 %v1091_v1  ;;  %959 = vmatprep.subr.mxu1 %v1091_v1 }
  0xc2   :  { %945 = vmatpush3.msra.mxu0 %v512_v3  ;;  %960 = vmatpush3.msra.mxu1 %v691_v4 }
  0xc3   :  { %946 = vmatprep.subr.mxu0 %v1091_v1  ;;  %961 = vmatprep.subr.mxu1 %v1091_v1 }
  0xc4   :  { %947 = vmatpush3.msra.mxu0 %v511_v6  ;;  %962 = vmatpush3.msra.mxu1 %v690_v9 }
  0xc5   :  { %948 = vmatprep.subr.mxu0 %v1091_v1  ;;  %963 = vmatprep.subr.mxu1 %v1091_v1 }
  0xc6   :  { %949 = vmatpush3.msra.mxu0 %v510_v10  ;;  %950 = vmatprep.mubr.msk.f32.mxu0 %vm1092_vm0, %v1091_v1 }
  0xc7   :  { %964 = vmatpush3.msra.mxu1 %v689_v11  ;;  %965 = vmatprep.mubr.msk.f32.mxu1 %vm1092_vm0, %v1091_v1 }
  0xd2   :  { %v532_v12 = vpop.trf.xlu0  ;;  %v711_v13 = vpop.trf.xlu1 }
  0xd3   :  { %951 = vmatmul.mubr.msk.f32.vlgmr.msra.gmra.mxu0 %vm264_vm7, %v532_v12  ;;  %966 = vmatmul.mubr.msk.f32.vlgmr.msra.gmra.mxu1 %vm264_vm7, %v711_v13 }
 0x17b   :  { %v334_v18 = vpop.f32.mrf.mxu0  ;;  %v439_v19 = vpop.f32.mrf.mxu1 }
 0x17c   :  { %v440_v20 = vadd.f32 %v439_v19, %v334_v18 }
 0x17d   :  { %v922_v5 = vpop.f32.mrf.mxu0  ;;  %v937_v8 = vpop.f32.mrf.mxu1 }
 0x193   :  { %v617_v21 = vpop.f32.mrf.mxu0  ;;  %v796_v22 = vpop.f32.mrf.mxu1 }
 0x194   :  { %v621_v23 = vadd.f32 %v617_v21, %v440_v20 }
 0x195   :  { %v952_v24 = vpop.f32.mrf.mxu0  ;;  %v967_v1 = vpop.f32.mrf.mxu1 }
 0x196   :  { %v800_v25 = vadd.f32 %v796_v22, %v621_v23 }
 0x198   :  { %v808_v26 = vadd.f32 %v879_v2, %v800_v25 }
 0x19a   :  { %809 = vst [vmem:[#allocation10] sm:$0xff] %v808_v26 }
 0x19b   :  { %1068 = shalt.err (!%p1065_p10)
}
 0x19c   :  { %819 = dma.vmem_to_hbm [thread:$0]  %s817_s14, 128, %s1423_s5, [#allocation4]  }
 0x19d   :  { %1083 = dma.done.wait [#allocation4], 128  }
 0x19e   :  { %1084 = vsyncadd [#allocation4], 4294967168 }
 0x19f   :  { %823 = vsyncpa [#allocation3], 1 }
 0x1a0   :  { %824 = vsyncpa [#allocation6], 1 }
 0x1a1   :  { %825 = vsyncpa [#allocation9], 1 }
 0x1a2   :  { %826 = vsyncpa [#allocation4], 1 }

</bundles_post_ra>
